<compile_context>
chip_gen: v7x
topology: tpu7x:2x2x1
jax: 0.10.0
libtpu: 0.0.40
codegen_flags: <defaults>
</compile_context>

<pallas_src>
import math

import jax
import jax.numpy as jnp
from jax.experimental import pallas as pl
from jax.experimental.pallas import tpu as pltpu

LEAKY_RELU_NEG_SLOPE = 0.2  # config.LeakyReLU_leak (deterministic default)


def _kaiming_normal_conv1x1(key, in_channels, out_channels, neg_slope):
    """kaiming_normal_(a=neg_slope, mode='fan_in', nonlinearity='leaky_relu')
    for Conv2d(in_channels, out_channels, kernel_size=1).  fan_in = in_channels.
    Stored as (C_in, C_out) so out[c] = sum_k w[k, c] * x[k]."""
    gain = math.sqrt(2.0 / (1.0 + neg_slope ** 2))
    std = gain / math.sqrt(float(in_channels))
    return std * jax.random.normal(key, (in_channels, out_channels), dtype=jnp.float32)


def _to_image_kernel(w_ref, x_ref, o_ref):
    # w_ref: (C_in*C_out,) f32 scalars, flat in SMEM (grid-invariant, 12 reads).
    # x_ref: (C_in,  R, L) f32 VMEM tile; each x_ref[k] is a dense (R, L) slab.
    # o_ref: (C_out, R, L) f32 VMEM tile; each o_ref[c] store is a dense slab.
    c_in = x_ref.shape[0]
    c_out = o_ref.shape[0]
    for c in range(c_out):                       # C_out small & static -> unrolled
        acc = x_ref[0] * w_ref[0 * c_out + c]    # (R, L) VPU broadcast-FMAs, no MXU
        for k in range(1, c_in):
            acc = acc + x_ref[k] * w_ref[k * c_out + c]
        o_ref[c] = jnp.tanh(acc)                 # EUP tanh on a dense slab, f32


def _pick_rows_tile(total_rows, n_batch, c_in, c_out,
                    max_tile_bytes=32 << 20, min_parallel_steps=2):
    """Rows-per-tile (second-to-last dim) for the (C, rows, 128) layout.

    Legal values are multiples of 8 that divide total_rows, or the full extent
    (the (8,128) BlockSpec rule).  Picks the largest legal value whose
    double-buffered in+out VMEM footprint stays under `max_tile_bytes`, and,
    when the batch axis alone cannot feed both v7x TensorCores, caps the tile
    so the grid still has >= `min_parallel_steps` parallel iterations.
    """
    bytes_per_row = 2 * (c_in + c_out) * 128 * 4   # double-buffered in + out
    cap = max(8, max_tile_bytes // bytes_per_row)
    if n_batch < min_parallel_steps:
        cap = min(cap, max(8, total_rows // min_parallel_steps))
    candidates = [t for t in range(8, total_rows + 1, 8) if total_rows % t == 0]
    fitting = [t for t in candidates if t <= cap]
    if fitting:
        return max(fitting)
    if candidates:
        return min(candidates)
    return total_rows   # no multiple-of-8 divisor (tiny HW) -> full-extent block


def to_image_forward(x_nchw, weight_cin_cout):
    """x_nchw: (N, C_in, H, W) float32; weight: (C_in, C_out) float32.
    Returns (N, C_out, H, W) float32 == nn.Conv2d(k=1, bias=False) -> nn.Tanh."""
    N, C_in, H, W = x_nchw.shape
    C_in_w, C_out = weight_cin_cout.shape
    assert C_in_w == C_in, (C_in_w, C_in)
    HW = H * W

    # Dense layout: channels on the leading (untiled) axis, spatial split as
    # (rows, 128) so per-channel slabs are vreg-dense.  Pure reshape of NCHW.
    if HW % 128 == 0:
        lanes = 128
        total_rows = HW // 128
    else:
        # Small / odd resolutions: single full-extent lane block (masked partial
        # stores are acceptable at this size).  Guard the VMEM footprint.
        assert HW <= 16384, f"HW={HW} is not a multiple of 128 and too large to tile"
        lanes = HW
        total_rows = 1

    x4 = x_nchw.reshape(N, C_in, total_rows, lanes)     # no data movement
    w_flat = weight_cin_cout.reshape(C_in * C_out)      # 12 scalars, 1-D SMEM

    rows_tile = _pick_rows_tile(total_rows, N, C_in, C_out)
    n_row_tiles = total_rows // rows_tile
    grid = (N, n_row_tiles)   # both axes independent -> fully parallel grid

    out4 = pl.pallas_call(
        _to_image_kernel,
        out_shape=jax.ShapeDtypeStruct((N, C_out, total_rows, lanes), jnp.float32),
        grid_spec=pltpu.PrefetchScalarGridSpec(
            num_scalar_prefetch=0,
            grid=grid,
            in_specs=[
                # 12 weight scalars resident in SMEM for the whole kernel.
                pl.BlockSpec(memory_space=pltpu.MemorySpace.SMEM),
                # (1, C_in, rows_tile, 128) input blocks; batch dim squeezed.
                pl.BlockSpec((None, C_in, rows_tile, lanes),
                             lambda n, j: (n, 0, j, 0)),
            ],
            # Dense output blocks: (rows_tile, 128) slabs per color channel.
            out_specs=pl.BlockSpec((None, C_out, rows_tile, lanes),
                                   lambda n, j: (n, 0, j, 0)),
        ),
        compiler_params=pltpu.CompilerParams(
            dimension_semantics=("parallel", "parallel"),
            # Double-buffered footprint is 2*(C_in+C_out)*rows_tile*lanes*4 B,
            # kept <= ~32 MiB by _pick_rows_tile; 48 MiB is safe on v7x's 64 MiB
            # physical VMEM and leaves ample headroom on v5e/v6e (128 MiB).
            vmem_limit_bytes=48 * 1024 * 1024,
        ),
    )(w_flat, x4)

    # (N, C_out, HW//128, 128) -> (N, C_out, H, W): pure reshape.
    return out4.reshape(N, C_out, H, W)


if __name__ == "__main__":
    key = jax.random.PRNGKey(0)
    k_x, k_w = jax.random.split(key)

    batch, in_channels, spatial, n_colors = 2, 4, 16, 3
    x = jax.random.normal(
        k_x, (batch, in_channels, spatial, spatial), dtype=jnp.float32
    )
    w = _kaiming_normal_conv1x1(k_w, in_channels, n_colors, LEAKY_RELU_NEG_SLOPE)

    out = to_image_forward(x, w)
    out = jax.block_until_ready(out)

    # Reference check against plain-JAX 1x1 conv + tanh.
    ref = jnp.tanh(jnp.einsum("nchw,co->nohw", x, w))
    assert out.shape == (batch, n_colors, spatial, spatial), out.shape
    assert jnp.allclose(out, ref, atol=1e-5, rtol=1e-5), "mismatch vs reference"

    print("KERNEL_OK")
</pallas_src>

<mosaic_0001>
module attributes {stable_mosaic.version = 11 : i64} {
  func.func @_to_image_kernel(%arg0: i32, %arg1: i32, %arg2: memref<12xf32, #tpu.memory_space<smem>>, %arg3: memref<1x4x2x128xf32, #tpu.memory_space<vmem>>, %arg4: memref<1x3x2x128xf32, #tpu.memory_space<vmem>>) attributes {dimension_semantics = [#tpu.dimension_semantics<parallel>, #tpu.dimension_semantics<parallel>], iteration_bounds = array<i64: 2, 1>, scalar_prefetch = 0 : i64, scratch_operands = 0 : i64, tpu.core_type = #tpu.core_type<tc>, window_params = [{transform_indices = @transform_0, window_bounds = array<i64: 12>}, {transform_indices = @transform_1, window_bounds = array<i64: 1, 4, 2, 128>}, {transform_indices = @transform_2, window_bounds = array<i64: 1, 3, 2, 128>}]} {
    %c0 = arith.constant 0 : index
    %c0_0 = arith.constant 0 : index
    %c0_1 = arith.constant 0 : index
    %c0_2 = arith.constant 0 : index
    %0 = vector.load %arg3[%c0, %c0_0, %c0_1, %c0_2] : memref<1x4x2x128xf32, #tpu.memory_space<vmem>>, vector<1x1x2x128xf32>
    %1 = vector.shape_cast %0 : vector<1x1x2x128xf32> to vector<2x128xf32>
    %c0_3 = arith.constant 0 : index
    %2 = memref.load %arg2[%c0_3] : memref<12xf32, #tpu.memory_space<smem>>
    %3 = vector.broadcast %2 : f32 to vector<2x128xf32>
    %4 = arith.mulf %1, %3 : vector<2x128xf32>
    %c0_4 = arith.constant 0 : index
    %c1 = arith.constant 1 : index
    %c0_5 = arith.constant 0 : index
    %c0_6 = arith.constant 0 : index
    %5 = vector.load %arg3[%c0_4, %c1, %c0_5, %c0_6] : memref<1x4x2x128xf32, #tpu.memory_space<vmem>>, vector<1x1x2x128xf32>
    %6 = vector.shape_cast %5 : vector<1x1x2x128xf32> to vector<2x128xf32>
    %c3 = arith.constant 3 : index
    %7 = memref.load %arg2[%c3] : memref<12xf32, #tpu.memory_space<smem>>
    %8 = vector.broadcast %7 : f32 to vector<2x128xf32>
    %9 = arith.mulf %6, %8 : vector<2x128xf32>
    %10 = arith.addf %4, %9 : vector<2x128xf32>
    %c0_7 = arith.constant 0 : index
    %c2 = arith.constant 2 : index
    %c0_8 = arith.constant 0 : index
    %c0_9 = arith.constant 0 : index
    %11 = vector.load %arg3[%c0_7, %c2, %c0_8, %c0_9] : memref<1x4x2x128xf32, #tpu.memory_space<vmem>>, vector<1x1x2x128xf32>
    %12 = vector.shape_cast %11 : vector<1x1x2x128xf32> to vector<2x128xf32>
    %c6 = arith.constant 6 : index
    %13 = memref.load %arg2[%c6] : memref<12xf32, #tpu.memory_space<smem>>
    %14 = vector.broadcast %13 : f32 to vector<2x128xf32>
    %15 = arith.mulf %12, %14 : vector<2x128xf32>
    %16 = arith.addf %10, %15 : vector<2x128xf32>
    %c0_10 = arith.constant 0 : index
    %c3_11 = arith.constant 3 : index
    %c0_12 = arith.constant 0 : index
    %c0_13 = arith.constant 0 : index
    %17 = vector.load %arg3[%c0_10, %c3_11, %c0_12, %c0_13] : memref<1x4x2x128xf32, #tpu.memory_space<vmem>>, vector<1x1x2x128xf32>
    %18 = vector.shape_cast %17 : vector<1x1x2x128xf32> to vector<2x128xf32>
    %c9 = arith.constant 9 : index
    %19 = memref.load %arg2[%c9] : memref<12xf32, #tpu.memory_space<smem>>
    %20 = vector.broadcast %19 : f32 to vector<2x128xf32>
    %21 = arith.mulf %18, %20 : vector<2x128xf32>
    %22 = arith.addf %16, %21 : vector<2x128xf32>
    %23 = math.tanh %22 : vector<2x128xf32>
    %c0_14 = arith.constant 0 : index
    %c0_15 = arith.constant 0 : index
    %c0_16 = arith.constant 0 : index
    %c0_17 = arith.constant 0 : index
    %24 = vector.load %arg4[%c0_14, %c0_15, %c0_16, %c0_17] : memref<1x3x2x128xf32, #tpu.memory_space<vmem>>, vector<1x1x2x128xf32>
    %25 = vector.shape_cast %24 : vector<1x1x2x128xf32> to vector<2x128xf32>
    %26 = vector.shape_cast %23 : vector<2x128xf32> to vector<1x1x2x128xf32>
    tpu.vector_store %arg4[%c0_14, %c0_15, %c0_16, %c0_17], %26 {strides = array<i32>} : memref<1x3x2x128xf32, #tpu.memory_space<vmem>>, vector<1x1x2x128xf32>,
    %c0_18 = arith.constant 0 : index
    %c0_19 = arith.constant 0 : index
    %c0_20 = arith.constant 0 : index
    %c0_21 = arith.constant 0 : index
    %27 = vector.load %arg3[%c0_18, %c0_19, %c0_20, %c0_21] : memref<1x4x2x128xf32, #tpu.memory_space<vmem>>, vector<1x1x2x128xf32>
    %28 = vector.shape_cast %27 : vector<1x1x2x128xf32> to vector<2x128xf32>
    %c1_22 = arith.constant 1 : index
    %29 = memref.load %arg2[%c1_22] : memref<12xf32, #tpu.memory_space<smem>>
    %30 = vector.broadcast %29 : f32 to vector<2x128xf32>
    %31 = arith.mulf %28, %30 : vector<2x128xf32>
    %c0_23 = arith.constant 0 : index
    %c1_24 = arith.constant 1 : index
    %c0_25 = arith.constant 0 : index
    %c0_26 = arith.constant 0 : index
    %32 = vector.load %arg3[%c0_23, %c1_24, %c0_25, %c0_26] : memref<1x4x2x128xf32, #tpu.memory_space<vmem>>, vector<1x1x2x128xf32>
    %33 = vector.shape_cast %32 : vector<1x1x2x128xf32> to vector<2x128xf32>
    %c4 = arith.constant 4 : index
    %34 = memref.load %arg2[%c4] : memref<12xf32, #tpu.memory_space<smem>>
    %35 = vector.broadcast %34 : f32 to vector<2x128xf32>
    %36 = arith.mulf %33, %35 : vector<2x128xf32>
    %37 = arith.addf %31, %36 : vector<2x128xf32>
    %c0_27 = arith.constant 0 : index
    %c2_28 = arith.constant 2 : index
    %c0_29 = arith.constant 0 : index
    %c0_30 = arith.constant 0 : index
    %38 = vector.load %arg3[%c0_27, %c2_28, %c0_29, %c0_30] : memref<1x4x2x128xf32, #tpu.memory_space<vmem>>, vector<1x1x2x128xf32>
    %39 = vector.shape_cast %38 : vector<1x1x2x128xf32> to vector<2x128xf32>
    %c7 = arith.constant 7 : index
    %40 = memref.load %arg2[%c7] : memref<12xf32, #tpu.memory_space<smem>>
    %41 = vector.broadcast %40 : f32 to vector<2x128xf32>
    %42 = arith.mulf %39, %41 : vector<2x128xf32>
    %43 = arith.addf %37, %42 : vector<2x128xf32>
    %c0_31 = arith.constant 0 : index
    %c3_32 = arith.constant 3 : index
    %c0_33 = arith.constant 0 : index
    %c0_34 = arith.constant 0 : index
    %44 = vector.load %arg3[%c0_31, %c3_32, %c0_33, %c0_34] : memref<1x4x2x128xf32, #tpu.memory_space<vmem>>, vector<1x1x2x128xf32>
    %45 = vector.shape_cast %44 : vector<1x1x2x128xf32> to vector<2x128xf32>
    %c10 = arith.constant 10 : index
    %46 = memref.load %arg2[%c10] : memref<12xf32, #tpu.memory_space<smem>>
    %47 = vector.broadcast %46 : f32 to vector<2x128xf32>
    %48 = arith.mulf %45, %47 : vector<2x128xf32>
    %49 = arith.addf %43, %48 : vector<2x128xf32>
    %50 = math.tanh %49 : vector<2x128xf32>
    %c0_35 = arith.constant 0 : index
    %c1_36 = arith.constant 1 : index
    %c0_37 = arith.constant 0 : index
    %c0_38 = arith.constant 0 : index
    %51 = vector.load %arg4[%c0_35, %c1_36, %c0_37, %c0_38] : memref<1x3x2x128xf32, #tpu.memory_space<vmem>>, vector<1x1x2x128xf32>
    %52 = vector.shape_cast %51 : vector<1x1x2x128xf32> to vector<2x128xf32>
    %53 = vector.shape_cast %50 : vector<2x128xf32> to vector<1x1x2x128xf32>
    tpu.vector_store %arg4[%c0_35, %c1_36, %c0_37, %c0_38], %53 {strides = array<i32>} : memref<1x3x2x128xf32, #tpu.memory_space<vmem>>, vector<1x1x2x128xf32>,
    %c0_39 = arith.constant 0 : index
    %c0_40 = arith.constant 0 : index
    %c0_41 = arith.constant 0 : index
    %c0_42 = arith.constant 0 : index
    %54 = vector.load %arg3[%c0_39, %c0_40, %c0_41, %c0_42] : memref<1x4x2x128xf32, #tpu.memory_space<vmem>>, vector<1x1x2x128xf32>
    %55 = vector.shape_cast %54 : vector<1x1x2x128xf32> to vector<2x128xf32>
    %c2_43 = arith.constant 2 : index
    %56 = memref.load %arg2[%c2_43] : memref<12xf32, #tpu.memory_space<smem>>
    %57 = vector.broadcast %56 : f32 to vector<2x128xf32>
    %58 = arith.mulf %55, %57 : vector<2x128xf32>
    %c0_44 = arith.constant 0 : index
    %c1_45 = arith.constant 1 : index
    %c0_46 = arith.constant 0 : index
    %c0_47 = arith.constant 0 : index
    %59 = vector.load %arg3[%c0_44, %c1_45, %c0_46, %c0_47] : memref<1x4x2x128xf32, #tpu.memory_space<vmem>>, vector<1x1x2x128xf32>
    %60 = vector.shape_cast %59 : vector<1x1x2x128xf32> to vector<2x128xf32>
    %c5 = arith.constant 5 : index
    %61 = memref.load %arg2[%c5] : memref<12xf32, #tpu.memory_space<smem>>
    %62 = vector.broadcast %61 : f32 to vector<2x128xf32>
    %63 = arith.mulf %60, %62 : vector<2x128xf32>
    %64 = arith.addf %58, %63 : vector<2x128xf32>
    %c0_48 = arith.constant 0 : index
    %c2_49 = arith.constant 2 : index
    %c0_50 = arith.constant 0 : index
    %c0_51 = arith.constant 0 : index
    %65 = vector.load %arg3[%c0_48, %c2_49, %c0_50, %c0_51] : memref<1x4x2x128xf32, #tpu.memory_space<vmem>>, vector<1x1x2x128xf32>
    %66 = vector.shape_cast %65 : vector<1x1x2x128xf32> to vector<2x128xf32>
    %c8 = arith.constant 8 : index
    %67 = memref.load %arg2[%c8] : memref<12xf32, #tpu.memory_space<smem>>
    %68 = vector.broadcast %67 : f32 to vector<2x128xf32>
    %69 = arith.mulf %66, %68 : vector<2x128xf32>
    %70 = arith.addf %64, %69 : vector<2x128xf32>
    %c0_52 = arith.constant 0 : index
    %c3_53 = arith.constant 3 : index
    %c0_54 = arith.constant 0 : index
    %c0_55 = arith.constant 0 : index
    %71 = vector.load %arg3[%c0_52, %c3_53, %c0_54, %c0_55] : memref<1x4x2x128xf32, #tpu.memory_space<vmem>>, vector<1x1x2x128xf32>
    %72 = vector.shape_cast %71 : vector<1x1x2x128xf32> to vector<2x128xf32>
    %c11 = arith.constant 11 : index
    %73 = memref.load %arg2[%c11] : memref<12xf32, #tpu.memory_space<smem>>
    %74 = vector.broadcast %73 : f32 to vector<2x128xf32>
    %75 = arith.mulf %72, %74 : vector<2x128xf32>
    %76 = arith.addf %70, %75 : vector<2x128xf32>
    %77 = math.tanh %76 : vector<2x128xf32>
    %c0_56 = arith.constant 0 : index
    %c2_57 = arith.constant 2 : index
    %c0_58 = arith.constant 0 : index
    %c0_59 = arith.constant 0 : index
    %78 = vector.load %arg4[%c0_56, %c2_57, %c0_58, %c0_59] : memref<1x3x2x128xf32, #tpu.memory_space<vmem>>, vector<1x1x2x128xf32>
    %79 = vector.shape_cast %78 : vector<1x1x2x128xf32> to vector<2x128xf32>
    %80 = vector.shape_cast %77 : vector<2x128xf32> to vector<1x1x2x128xf32>
    tpu.vector_store %arg4[%c0_56, %c2_57, %c0_58, %c0_59], %80 {strides = array<i32>} : memref<1x3x2x128xf32, #tpu.memory_space<vmem>>, vector<1x1x2x128xf32>,
    return
  }
  func.func @transform_0(%arg0: i32, %arg1: i32) -> i32 {
    %c0_i32 = arith.constant 0 : i32
    %c0_i32_0 = arith.constant 0 : i32
    return %c0_i32 : i32
  }
  func.func @transform_1(%arg0: i32, %arg1: i32) -> (i32, i32, i32, i32) {
    %c0_i32 = arith.constant 0 : i32
    %c0_i32_0 = arith.constant 0 : i32
    %c0_i32_1 = arith.constant 0 : i32
    return %arg0, %c0_i32, %arg1, %c0_i32_0 : i32, i32, i32, i32
  }
  func.func @transform_2(%arg0: i32, %arg1: i32) -> (i32, i32, i32, i32) {
    %c0_i32 = arith.constant 0 : i32
    %c0_i32_0 = arith.constant 0 : i32
    %c0_i32_1 = arith.constant 0 : i32
    return %arg0, %c0_i32, %arg1, %c0_i32_0 : i32, i32, i32, i32
  }
}

</mosaic_0001>

<bundles_post_ra>
// kernel: tpu_custom_call.1
= control target key start
LH: loop header
LB: loop body
LE: loop exit
PB: predicated region body
PF: predicated region fallthrough
CT: control target
= control target key end

     0   :  { %7 = vsyncpa [#allocation5], 0  ;;  %s871_s0 = inlined_call_operand.hbm [shape: f32[12], index: 0, kind: input, shape index: {}]   ;;  %s872_s1 = inlined_call_operand.hbm [shape: f32[2,4,2,128], index: 1, kind: input, shape index: {}]   ;;  %s873_s2 = inlined_call_operand.hbm [shape: f32[2,3,2,128], index: 2, kind: output, shape index: {}]  }
   0x1   :  { %8 = vsyncpa [#allocation3], 0 }
   0x2   :  { %10 = vsyncpa [#allocation3 + $0x1], 0 }
   0x3   :  { %11 = vsyncpa [#allocation4], 0 }
   0x4   :  { %13 = vsyncpa [#allocation4 + $0x1], 0  ;;  %s646_s9 = smov 0   ;;  %s648_s10 = smov 0  }
   0x5   :  { %s650_s11 = smov 0   ;;  %s652_s12 = smov 0  }
   0x6   :  { %s654_s13 = smov 0   ;;  %s656_s14 = smov 0  }
   0x7 LB: > { %s371_s15 = sadd.s32 4294967295, %s622_s14   ;;  %s372_s16 = sadd.s32 4294967294, %s622_s14   ;;  %s622_s14 = sphi %s656_s14, %s19_s14   ;;  %s618_s13 = sphi %s654_s13, %s893_s13   ;;  %s614_s12 = sphi %s652_s12, %s892_s12   ;;  %s610_s11 = sphi %s650_s11, %s891_s11   ;;  %s606_s10 = sphi %s648_s10, %s890_s10   ;;  %s602_s9 = sphi %s646_s9, %s889_s9  }
   0x8   : > { %s61_s17 = sadd.s32 1, %s610_s11  ;;  %p68_p0 = scmp.ne.s32.totalorder %s610_s11, %s606_s10 }
   0x9   : > { %p69_p1 = scmp.eq.s32.totalorder %s622_s14, 0  ;;  %p74_p2 = scmp.ne.s32.totalorder %s606_s10, %s602_s9 }
   0xa   : > { %p684_p3 = scmp.eq.s32.totalorder %s371_s15, 0  ;;  %p100_p4 = scmp.eq.s32.totalorder %s371_s15, 1 }
   0xb   : > { %p70_p5 = por %p69_p1, %p68_p0  ;;  %p106_p6 = scmp.eq.s32.totalorder %s372_s16, 1 }
   0xc   : > { %s878_s18 = scalar_select %p684_p3, 1, 0 }
   0xd   : > { %p690_p7 = por %p684_p3, %p74_p2  ;;  %p694_p8 = por %p100_p4, %p68_p0 }
   0xe   : > { %p698_p9 = por %p106_p6, %p74_p2  ;;  %p373_p10 = scmp.ge.s32.totalorder %s622_s14, 1 }
   0xf   : > { %s879_s19 = scalar_select %p690_p7, 1, 0 }
  0x10   : > { %s880_s20 = scalar_select %p694_p8, 1, 0 }
  0x11   : > { %s881_s21 = scalar_select %p698_p9, 1, 0 }
  0x12   : > { %p113_p11 = scmp.lt.s32.totalorder %s622_s14, 3  ;;  %p431_p1 = scmp.lt.s32.totalorder %s622_s14, 2 }
  0x13   : > { %s135_s23 = sand.u32 1, %s610_s11   ;;  %s31_s25 = sadd.s32 1, %s618_s13 }
  0x14   : > { %p705_p13 = pnand %p373_p10, %p113_p11  ;;  %p713_p0 = pnand %p431_p1, %p70_p5 }
  0x15   : > { %s376_s26 = sshll.u32 %s135_s23, 3  ;;  %p33_p4 = scmp.ge.s32.totalorder %s31_s25, 2 }
  0x16   : > { %p418_p7 = pneg %p705_p13  ;;  %s493_s29 = scalar_lea.hbm %s871_s0, 16 }
  0x17   : > { %p494_p6 = scmp.ne.s32.totalorder %s871_s0, %s493_s29  ;;  %p500_p5 = scmp.lt.u32.totalorder %s493_s29, %s871_s0 }
  0x18   : > { %p419_p2 = pnand %p418_p7, %p684_p3 }
  0x1a   : > { %p495_p10 = pneg %p419_p2 }
  0x1c   : > { %p496_p11 = pnand %p495_p10, %p494_p6 }
  0x1e   : > { %p497_p12 = pneg %p496_p11 }
  0x20   : > { %p502_p1 = pnand %p500_p5, %p497_p12 }
  0x22   : > { %505 = shalt.err (!%p502_p1)
}
  0x23   : > { %s624_s6 = smov [#allocation2]   ;;  %s895_s25 = smov (%p33_p4, %s31_s25), 0 }
  0x24   : > { %421 = dma.hbm_to_smem (!%p419_p2), %s871_s0, 16, %s624_s6, [#allocation5]  }
  0x25   : > { %s407_s15 = sshll.u32 %s618_s13, 7  ;;  %s56_s16 = ssub.s32 %s618_s13, %s895_s25 }
  0x26   : > { %s740_s29 = scalar_lea.hbm %s872_s1, %s407_s15  ;;  %p59_p7 = scmp.eq.s32.totalorder %s56_s16, 0 }
  0x27   : > { %s139_s30 = scalar_lea.vmem [#allocation6], %s376_s26  ;;  %s749_s5 = scalar_lea.sflag [#allocation3], %s135_s23 }
  0x28   : > { %s147_s3 = sshll.u32 %s139_s30, 4  ;;  %s506_s6 = scalar_lea.hbm %s740_s29, 128  ;;  %s742_s3 = int_to_ptr.vmem [resolvable:$true] %s147_s3 }
  0x29   : > { %s747_s4 = scalar_select %p59_p7, %s610_s11, %s61_s17  }
  0x2a   : > { %p507_p12 = scmp.ne.s32.totalorder %s740_s29, %s506_s6  ;;  %p508_p2 = pneg %p713_p0 }
  0x2b   : > { %s511_s26 = scalar_lea.hbm %s872_s1, 256  ;;  %p512_p10 = scmp.lt.u32.totalorder %s740_s29, %s872_s1 }
  0x2c   : > { %p509_p4 = pnand %p508_p2, %p507_p12  ;;  %p513_p11 = scmp.lt.u32.totalorder %s511_s26, %s506_s6 }
  0x2d   : > { %p515_p1 = scmp.lt.u32.totalorder %s506_s6, %s740_s29 }
  0x2e   : > { %p510_p6 = pneg %p509_p4  ;;  %p514_p5 = por %p513_p11, %p512_p10 }
  0x30   : > { %p516_p7 = por %p515_p1, %p514_p5 }
  0x32   : > { %p517_p9 = pnand %p516_p7, %p510_p6 }
  0x34   : > { %520 = shalt.err (!%p517_p9)
}
  0x35   : > { %s521_s17 = scalar_lea.vmem %s742_s3, 128  ;;  %s625_s23 = smov [#allocation6]  }
  0x36   : > { %p522_p12 = scmp.ne.s32.totalorder %s742_s3, %s521_s17  ;;  %s526_s27 = sshll.u32 %s625_s23, 4  ;;  %s527_s27 = int_to_ptr.vmem [resolvable:$false] %s526_s27 }
  0x37   : > { %s528_s28 = scalar_lea.vmem %s527_s27, 256  ;;  %p529_p3 = scmp.lt.s32.totalorder %s742_s3, %s527_s27 }
  0x38   : > { %p524_p4 = pnand %p522_p12, %p508_p2  ;;  %p530_p10 = scmp.lt.s32.totalorder %s528_s28, %s521_s17 }
  0x3a   : > { %p525_p8 = pneg %p524_p4  ;;  %p531_p11 = por %p530_p10, %p529_p3 }
  0x3c   : > { %p532_p5 = pnand %p531_p11, %p525_p8 }
  0x3e   : > { %535 = shalt.err (!%p532_p5)
}
  0x3f   : > { %s626_s30 = smov 32   ;;  %s627_s6 = smov 2  }
  0x40   : > { %425 = dma.hbm_to_vmem [thread:$0]  (!%p713_p0), %s740_s29, 128, %s742_s3, %s749_s5, %s626_s30, %s626_s30, %s627_s6  }
  0x41   : > { %159 = sbr.rel (%p705_p13) target bundleno = 125 (0x7d), region = 28  ;;  %p884_p9 = scmp.ne.s32.totalorder (!%p705_p13), %s878_s18, 0 }
  0x48   : > { %589 = dma.done.wait (%p884_p9), [#allocation5], 16  }
  0x49   : > { %591 = vsyncadd (%p884_p9), [#allocation5], 4294967280  ;;  %s784_s7 = sand.u32 1, %s606_s10   ;;  %p885_p3 = scmp.ne.s32.totalorder %s879_s19, 0 }
  0x4a   : > { %s381_s8 = sshll.u32 %s784_s7, 3  ;;  %s166_s26 = scalar_lea.sflag [#allocation3], %s784_s7 }
  0x4b   : > { %s788_s15 = scalar_lea.vmem [#allocation6], %s381_s8 }
  0x4c   : > { %593 = dma.done.wait (%p885_p3), %s166_s26, 128  }
  0x4d   : > { %595 = vsyncadd (%p885_p3), %s166_s26, 4294967168 }
  0x4e   : > { %174 = sfence }
  0x4f   : > { %s192_s22 = sld [smem:[#allocation2]]  ;;  %s383_s18 = sld [smem:[#allocation2 + $0x3]]  ;;  %v191_v0 = vld [vmem:[%s788_s15] sm:$0x3]  ;;  %v382_v1 = vld [vmem:[%s788_s15 + $0x2] sm:$0x3] }
  0x50   : > { %s385_s24 = sld [smem:[#allocation2 + $0x6]]  ;;  %s387_s29 = sld [smem:[#allocation2 + $0x9]]  ;;  %v384_v3 = vld [vmem:[%s788_s15 + $0x4] sm:$0x3]  ;;  %v386_v6 = vld [vmem:[%s788_s15 + $0x6] sm:$0x3] }
  0x51   : > { %s388_s3 = sld [smem:[#allocation2 + $0x1]]  ;;  %s390_s5 = sld [smem:[#allocation2 + $0x4]]  ;;  %v215_v9 = vld [vmem:[%s788_s15] sm:$0x3]  ;;  %v389_v12 = vld [vmem:[%s788_s15 + $0x2] sm:$0x3] }
  0x52   : > { %s392_s16 = sld [smem:[#allocation2 + $0x7]]  ;;  %s394_s19 = sld [smem:[#allocation2 + $0xa]]  ;;  %v391_v13 = vld [vmem:[%s788_s15 + $0x4] sm:$0x3]  ;;  %v393_v17 = vld [vmem:[%s788_s15 + $0x6] sm:$0x3] }
  0x53   : > { %s797_s17 = sld [smem:[#allocation2 + $0x2]]  ;;  %s398_s23 = sld [smem:[#allocation2 + $0x5]]  ;;  %v237_v21 = vld [vmem:[%s788_s15] sm:$0x3]  ;;  %v397_v22 = vld [vmem:[%s788_s15 + $0x2] sm:$0x3] }
  0x54   : > { %s801_s27 = sld [smem:[#allocation2 + $0x8]]  ;;  %s803_s28 = sld [smem:[#allocation2 + $0xb]]  ;;  %v399_v30 = vld [vmem:[%s788_s15 + $0x4] sm:$0x3]  ;;  %v401_v35 = vld [vmem:[%s788_s15 + $0x6] sm:$0x3] }
  0x55   : > { %v193_v2 = vstv %s192_s22  ;;  %v198_v5 = vstv %s383_s18  ;;  %s408_s30 = smul.u32 6, %s784_s7  ;;  %p886_p13 = scmp.ne.s32.totalorder %s880_s20, 0 }
  0x56   : > { %v194_v4 = vmul.f32 %v193_v2, %v191_v0  ;;  %v199_v7 = vmul.f32 %v382_v1, %v198_v5  ;;  %v204_v8 = vstv %s385_s24  ;;  %v210_v11 = vstv %s387_s29  ;;  %s409_s26 = smul.u32 96, %s614_s12  ;;  %s260_s24 = scalar_lea.sflag [#allocation4], %s784_s7 }
  0x57   : > { %v205_v10 = vmul.f32 %v384_v3, %v204_v8  ;;  %v211_v15 = vmul.f32 %v386_v6, %v210_v11  ;;  %v217_v16 = vstv %s388_s3  ;;  %v221_v19 = vstv %s390_s5  ;;  %s190_s6 = scalar_lea.vmem [#allocation7], %s408_s30  ;;  %s628_s12 = smov [#allocation7]  }
  0x58   : > { %v200_v14 = vadd.f32 %v199_v7, %v194_v4  ;;  %v218_v18 = vmul.f32 %v217_v16, %v215_v9  ;;  %v226_v20 = vstv %s392_s16  ;;  %v222_v24 = vmul.f32 %v389_v12, %v221_v19  ;;  %s274_s8 = sshll.u32 %s190_s6, 4  ;;  %s822_s18 = scalar_lea.hbm %s873_s2, %s409_s26  ;;  %s817_s8 = int_to_ptr.vmem [resolvable:$true] %s274_s8 }
  0x59   : > { %v227_v25 = vmul.f32 %v391_v13, %v226_v20  ;;  %v231_v26 = vstv %s394_s19  ;;  %v239_v28 = vstv %s797_s17  ;;  %v243_v29 = vstv %s398_s23  ;;  %s536_s29 = scalar_lea.vmem %s817_s8, 96  ;;  %s540_s3 = sshll.u32 %s628_s12, 4  ;;  %s541_s3 = int_to_ptr.vmem [resolvable:$false] %s540_s3 }
  0x5a   : > { %v206_v23 = vadd.f32 %v205_v10, %v200_v14  ;;  %v232_v27 = vmul.f32 %v393_v17, %v231_v26  ;;  %v223_v32 = vadd.f32 %v222_v24, %v218_v18  ;;  %v240_v33 = vmul.f32 %v239_v28, %v237_v21  ;;  %p537_p8 = scmp.ne.s32.totalorder %s817_s8, %s536_s29  ;;  %s542_s5 = scalar_lea.vmem %s541_s3, 192 }
  0x5b   : > { %v244_v34 = vmul.f32 %v397_v22, %v243_v29  ;;  %v248_v36 = vstv %s801_s27  ;;  %v253_v37 = vstv %s803_s28  ;;  %p543_p6 = scmp.lt.s32.totalorder %s817_s8, %s541_s3  ;;  %p544_p1 = scmp.lt.s32.totalorder %s542_s5, %s536_s29 }
  0x5c   : > { %v212_v31 = vadd.f32 %v211_v15, %v206_v23  ;;  %v228_v38 = vadd.f32 %v227_v25, %v223_v32  ;;  %v249_v40 = vmul.f32 %v399_v30, %v248_v36  ;;  %v254_v41 = vmul.f32 %v401_v35, %v253_v37  ;;  %p538_p0 = pnand %p537_p8, %p886_p13 }
  0x5d   : > { %v245_v39 = vadd.f32 %v244_v34, %v240_v33  ;;  %p545_p7 = por %p544_p1, %p543_p6 }
  0x5e   : > { %487 = vtanh.f32 %v212_v31  ;;  %v233_v42 = vadd.f32 %v232_v27, %v228_v38  ;;  %p539_p2 = pneg %p538_p0 }
  0x5f   : > { %v250_v43 = vadd.f32 %v249_v40, %v245_v39 }
  0x60   : > { %489 = vtanh.f32 %v233_v42  ;;  %p546_p12 = pnand %p545_p7, %p539_p2 }
  0x61   : > { %v255_v44 = vadd.f32 %v254_v41, %v250_v43 }
  0x63   : > { %491 = vtanh.f32 %v255_v44 }
  0x68   : > { %v488_v45 = vpop.eup %487 }
  0x69   : > { %214 = vst [vmem:[%s190_s6] sm:$0x3] %v488_v45 }
  0x6a   : > { %v490_v46 = vpop.eup %489 }
  0x6b   : > { %395 = vst [vmem:[%s190_s6 + $0x2] sm:$0x3] %v490_v46 }
  0x6d   : > { %v492_v47 = vpop.eup %491 }
  0x6e   : > { %403 = vst [vmem:[%s190_s6 + $0x4] sm:$0x3] %v492_v47 }
  0x6f   : > { %549 = shalt.err (!%p546_p12)
}
  0x70   : > { %s550_s16 = scalar_lea.hbm %s822_s18, 96  ;;  %s554_s23 = scalar_lea.hbm %s873_s2, 192 }
  0x71   : > { %p551_p4 = scmp.ne.s32.totalorder %s822_s18, %s550_s16  ;;  %p555_p5 = scmp.lt.u32.totalorder %s822_s18, %s873_s2 }
  0x72   : > { %p556_p9 = scmp.lt.u32.totalorder %s554_s23, %s550_s16  ;;  %p558_p8 = scmp.lt.u32.totalorder %s550_s16, %s822_s18 }
  0x73   : > { %p552_p10 = pnand %p551_p4, %p886_p13 }
  0x74   : > { %p557_p3 = por %p556_p9, %p555_p5 }
  0x75   : > { %p553_p11 = pneg %p552_p10 }
  0x76   : > { %p559_p0 = por %p558_p8, %p557_p3 }
  0x78   : > { %p560_p2 = pnand %p559_p0, %p553_p11 }
  0x7a   : > { %563 = shalt.err (!%p560_p2)
}
  0x7b   : > { %s629_s30 = smov 32   ;;  %s630_s6 = smov 2  }
  0x7c   : > { %416 = dma.vmem_to_hbm [thread:$0]  (%p886_p13), %s817_s8, 96, %s822_s18, %s260_s24, %s629_s30, %s629_s30, %s630_s6  }
  0x7d PF: > { %s289_s26 = sand.u32 1, %s602_s9   ;;  %p887_p6 = scmp.ne.s32.totalorder %s881_s21, 0 }
  0x7e   : > { %p888_p1 = scmp.ge.s32.totalorder %s622_s14, 2  ;;  %s290_s15 = scalar_lea.sflag [#allocation4], %s289_s26 }
  0x80   : > { %p427_p7 = pnand %p888_p1, %p887_p6 }
  0x82   : > { %597 = dma.done.wait (!%p427_p7), %s290_s15, 96  }
  0x83   : > { %599 = vsyncadd (!%p427_p7), %s290_s15, 4294967200  ;;  %s19_s14 = sadd.s32 1, %s622_s14   ;;  %s889_s9 = smov %s606_s10 }
  0x84   : > { %p16_p12 = scmp.ge.s32.totalorder %s19_s14, 4   ;;  %s890_s10 = smov %s610_s11 }
  0x85   : > { %s891_s11 = smov %s747_s4  ;;  %s892_s12 = smov %s618_s13 }
  0x86   : > { %s893_s13 = smov %s895_s25  ;;  %18 = sbr.rel (!%p16_p12) target bundleno = 7 (0x7), region = 83 }
  0x8d   :  { %295 = vsyncpa [#allocation3], 1 }
  0x8e   :  { %297 = vsyncpa [#allocation3 + $0x1], 1 }
  0x8f   :  { %298 = vsyncpa [#allocation4], 1 }
  0x90   :  { %300 = vsyncpa [#allocation4 + $0x1], 1 }
  0x91   :  { %301 = vsyncpa [#allocation5], 1 }
  0x92   :  { %303 = vsyncpa [#allocation5 + $0x1], 1 }

</bundles_post_ra>
